<compile_context>
chip_gen: v7x
topology: tpu7x:2x2x1
jax: 0.10.0
libtpu: 0.0.40
codegen_flags: <defaults>
</compile_context>

<pallas_src>
import functools

import jax
import jax.numpy as jnp
from jax.experimental import pallas as pl
from jax.experimental.pallas import tpu as pltpu

WORD_LENGTH = 16
_LEVELS = float(2 ** (WORD_LENGTH - 1) - 1)   # 32767 for word_length=16


def _quantize(h):
    """Symmetric max-abs linear quantization to WORD_LENGTH bits (f32 math).

    Padded rows/cols are exactly 0 and h >= 0 post-ReLU, so padding does not
    perturb the max-abs scale.
    """
    amax = jnp.max(jnp.abs(h))
    scale = jnp.where(amax > 0.0, amax / _LEVELS, jnp.float32(1.0))
    inv_scale = 1.0 / scale            # scalar exact reciprocal (hoisted)
    q = jnp.round(h * inv_scale) * scale
    return jnp.where(amax > 0.0, q, h)


def _subnet_mlp_kernel(x_ref, w1_ref, w2_ref, wlast_ref, y_ref, mem_ref):
    # Tiny MLP: everything lives in a single VMEM block -> one fused,
    # grid-less invocation.  Weights arrive pre-masked, bf16, (out, in).
    contract_last = (((1,), (1,)), ((), ()))   # x @ w.T without transposing w

    # --- fc1 (masked weight pre-applied) + ReLU + quant --------------------
    h1 = jax.lax.dot_general(x_ref[...], w1_ref[...],
                             dimension_numbers=contract_last,
                             preferred_element_type=jnp.float32)
    h1 = jnp.maximum(h1, 0.0)
    h1 = _quantize(h1)

    # --- fc2 (masked weight pre-applied) + ReLU + quant --------------------
    h2 = jax.lax.dot_general(h1.astype(w2_ref.dtype), w2_ref[...],
                             dimension_numbers=contract_last,
                             preferred_element_type=jnp.float32)
    h2 = jnp.maximum(h2, 0.0)
    h2 = _quantize(h2)

    mem_ref[...] = h2.astype(mem_ref.dtype)

    # --- task head (plain linear, no bias) ---------------------------------
    y = jax.lax.dot_general(h2.astype(wlast_ref.dtype), wlast_ref[...],
                            dimension_numbers=contract_last,
                            preferred_element_type=jnp.float32)
    y_ref[...] = y.astype(y_ref.dtype)


def _round_up(n, m):
    return ((n + m - 1) // m) * m


@functools.partial(jax.jit, static_argnames=("task_id",))
def subnet_mlp_forward(x_nchw, params, masks, task_id):
    """Runs SubnetMLPNet.forward(x, task_id, mask, mode) on TPU via Pallas."""
    bsz = x_nchw.shape[0]
    x = x_nchw.reshape(bsz, -1)                       # (B, 784)

    w1, w2, w_last_all = params["fc1"], params["fc2"], params["last"]
    m1, m2 = masks["fc1"], masks["fc2"]
    w_last = w_last_all[task_id]                      # select task head (glue)

    n_hidden = w1.shape[0]
    n_out = w_last.shape[0]

    # Pre-apply subnet masks + cast to bf16 OUTSIDE the kernel (XLA), so the
    # kernel only DMAs half the weight bytes and no mask bytes at all.
    w1m = (w1 * m1).astype(jnp.bfloat16)
    w2m = (w2 * m2).astype(jnp.bfloat16)
    wl = w_last.astype(jnp.bfloat16)
    xb = x.astype(jnp.bfloat16)

    # Pad to hardware tiles: batch -> sublane multiple (8), hidden/out widths
    # -> lane multiple (128) so output stores are lane-dense.  Pads are zeros
    # and are sliced off below; they do not affect ReLU/quant/matmul results.
    b_pad = _round_up(bsz, 8)
    h_pad = _round_up(n_hidden, 128)
    o_pad = _round_up(n_out, 128)

    xb = jnp.pad(xb, ((0, b_pad - bsz), (0, 0)))
    w1m = jnp.pad(w1m, ((0, h_pad - n_hidden), (0, 0)))
    w2m = jnp.pad(w2m, ((0, h_pad - n_hidden), (0, h_pad - n_hidden)))
    wl = jnp.pad(wl, ((0, o_pad - n_out), (0, h_pad - n_hidden)))

    vmem = pl.BlockSpec(memory_space=pltpu.MemorySpace.VMEM)

    y_p, mem_p = pl.pallas_call(
        _subnet_mlp_kernel,
        out_shape=(
            jax.ShapeDtypeStruct((b_pad, o_pad), jnp.float32),
            jax.ShapeDtypeStruct((b_pad, h_pad), jnp.float32),
        ),
        in_specs=[vmem] * 4,
        out_specs=(vmem, vmem),
    )(xb, w1m, w2m, wl)

    # Slice the tile padding back off (semantics identical to the reference).
    return y_p[:bsz, :n_out], mem_p[:bsz, :n_hidden]


def _make_mask(key, shape, sparsity):
    """Binary subnet mask: keep top-(1-sparsity) fraction by |score|."""
    scores = jax.random.normal(key, shape, dtype=jnp.float32)
    thresh = jnp.quantile(jnp.abs(scores), sparsity)
    return (jnp.abs(scores) >= thresh).astype(jnp.float32)


if __name__ == "__main__":
    key = jax.random.PRNGKey(0)
    k_x, k_w1, k_w2, k_wl, k_m1, k_m2 = jax.random.split(key, 6)

    # Small, forward-consistent shapes: MNIST-like input (784 = 28*28),
    # hidden = 32, two tasks of 10 classes each.
    batch = 2
    in_features = 784
    n_hidden = 32
    taskcla = [(0, 10), (1, 10)]
    sparsity = 0.5
    task_id = 0

    x = jax.random.normal(k_x, (batch, 1, 28, 28), dtype=jnp.float32)

    def _linear_init(k, out_f, in_f):
        bound = 1.0 / jnp.sqrt(jnp.float32(in_f))
        return jax.random.uniform(k, (out_f, in_f), jnp.float32, -bound, bound)

    params = {
        "fc1": _linear_init(k_w1, n_hidden, in_features),
        "fc2": _linear_init(k_w2, n_hidden, n_hidden),
        # stacked multi-head weights: (num_tasks, n_classes, n_hidden)
        "last": jnp.stack([
            _linear_init(kk, n, n_hidden)
            for kk, (_, n) in zip(jax.random.split(k_wl, len(taskcla)), taskcla)
        ]),
    }
    masks = {
        "fc1": _make_mask(k_m1, (n_hidden, in_features), sparsity),
        "fc2": _make_mask(k_m2, (n_hidden, n_hidden), sparsity),
    }

    y, to_memory = subnet_mlp_forward(x, params, masks, task_id)
    jax.block_until_ready((y, to_memory))

    assert y.shape == (batch, taskcla[task_id][1])
    assert to_memory.shape == (batch, n_hidden)
    print("KERNEL_OK")
</pallas_src>

<mosaic_0001>
module attributes {stable_mosaic.version = 11 : i64} {
  func.func @_subnet_mlp_kernel(%arg0: memref<8x784xbf16, #tpu.memory_space<vmem>>, %arg1: memref<128x784xbf16, #tpu.memory_space<vmem>>, %arg2: memref<128x128xbf16, #tpu.memory_space<vmem>>, %arg3: memref<128x128xbf16, #tpu.memory_space<vmem>>, %arg4: memref<8x128xf32, #tpu.memory_space<vmem>>, %arg5: memref<8x128xf32, #tpu.memory_space<vmem>>) attributes {dimension_semantics = [], scalar_prefetch = 0 : i64, scratch_operands = 0 : i64, tpu.core_type = #tpu.core_type<tc>} {
    %c0 = arith.constant 0 : index
    %c0_0 = arith.constant 0 : index
    %0 = vector.load %arg0[%c0, %c0_0] : memref<8x784xbf16, #tpu.memory_space<vmem>>, vector<8x784xbf16>
    %c0_1 = arith.constant 0 : index
    %c0_2 = arith.constant 0 : index
    %1 = vector.load %arg1[%c0_1, %c0_2] : memref<128x784xbf16, #tpu.memory_space<vmem>>, vector<128x784xbf16>
    %cst = arith.constant dense<0.000000e+00> : vector<8x128xf32>
    %2 = tpu.matmul %0, %1, %cst {dimension_numbers = #tpu.dot_dimension_numbers<[1], [1], [0], [0], [0, 0, 1, 0], [], []>} : vector<8x784xbf16>, vector<128x784xbf16>, vector<8x128xf32> -> vector<8x128xf32>
    %cst_3 = arith.constant 0.000000e+00 : f32
    %3 = vector.broadcast %cst_3 : f32 to vector<8x128xf32>
    %4 = arith.maximumf %2, %3 : vector<8x128xf32>
    %5 = math.absf %4 : vector<8x128xf32>
    %6 = vector.shape_cast %5 : vector<8x128xf32> to vector<1x8x128xf32>
    %cst_4 = arith.constant dense<0xFF800000> : vector<1xf32>
    %7 = vector.multi_reduction <maximumf>, %6, %cst_4 [1, 2] : vector<1x8x128xf32> to vector<1xf32>
    %8 = vector.shape_cast %7 : vector<1xf32> to vector<1x1x1xf32>
    %9 = vector.extract %8[0, 0, 0] : f32 from vector<1x1x1xf32>
    %cst_5 = arith.constant 0.000000e+00 : f32
    %10 = arith.cmpf ogt, %9, %cst_5 : f32
    %cst_6 = arith.constant 3.276700e+04 : f32
    %11 = arith.divf %9, %cst_6 : f32
    %cst_7 = arith.constant 1.000000e+00 : f32
    %12 = arith.select %10, %11, %cst_7 : f32
    %cst_8 = arith.constant 1.000000e+00 : f32
    %13 = arith.divf %cst_8, %12 : f32
    %14 = vector.broadcast %13 : f32 to vector<8x128xf32>
    %15 = arith.mulf %4, %14 : vector<8x128xf32>
    %16 = math.roundeven %15 : vector<8x128xf32>
    %17 = vector.broadcast %12 : f32 to vector<8x128xf32>
    %18 = arith.mulf %16, %17 : vector<8x128xf32>
    %cst_9 = arith.constant 0.000000e+00 : f32
    %19 = arith.cmpf ogt, %9, %cst_9 : f32
    %20 = arith.select %19, %18, %4 : vector<8x128xf32>
    %21 = arith.truncf %20 : vector<8x128xf32> to vector<8x128xbf16>
    %c0_10 = arith.constant 0 : index
    %c0_11 = arith.constant 0 : index
    %22 = vector.load %arg2[%c0_10, %c0_11] : memref<128x128xbf16, #tpu.memory_space<vmem>>, vector<128x128xbf16>
    %cst_12 = arith.constant dense<0.000000e+00> : vector<8x128xf32>
    %23 = tpu.matmul %21, %22, %cst_12 {dimension_numbers = #tpu.dot_dimension_numbers<[1], [1], [0], [0], [0, 0, 1, 0], [], []>} : vector<8x128xbf16>, vector<128x128xbf16>, vector<8x128xf32> -> vector<8x128xf32>
    %cst_13 = arith.constant 0.000000e+00 : f32
    %24 = vector.broadcast %cst_13 : f32 to vector<8x128xf32>
    %25 = arith.maximumf %23, %24 : vector<8x128xf32>
    %26 = math.absf %25 : vector<8x128xf32>
    %27 = vector.shape_cast %26 : vector<8x128xf32> to vector<1x8x128xf32>
    %cst_14 = arith.constant dense<0xFF800000> : vector<1xf32>
    %28 = vector.multi_reduction <maximumf>, %27, %cst_14 [1, 2] : vector<1x8x128xf32> to vector<1xf32>
    %29 = vector.shape_cast %28 : vector<1xf32> to vector<1x1x1xf32>
    %30 = vector.extract %29[0, 0, 0] : f32 from vector<1x1x1xf32>
    %cst_15 = arith.constant 0.000000e+00 : f32
    %31 = arith.cmpf ogt, %30, %cst_15 : f32
    %cst_16 = arith.constant 3.276700e+04 : f32
    %32 = arith.divf %30, %cst_16 : f32
    %cst_17 = arith.constant 1.000000e+00 : f32
    %33 = arith.select %31, %32, %cst_17 : f32
    %cst_18 = arith.constant 1.000000e+00 : f32
    %34 = arith.divf %cst_18, %33 : f32
    %35 = vector.broadcast %34 : f32 to vector<8x128xf32>
    %36 = arith.mulf %25, %35 : vector<8x128xf32>
    %37 = math.roundeven %36 : vector<8x128xf32>
    %38 = vector.broadcast %33 : f32 to vector<8x128xf32>
    %39 = arith.mulf %37, %38 : vector<8x128xf32>
    %cst_19 = arith.constant 0.000000e+00 : f32
    %40 = arith.cmpf ogt, %30, %cst_19 : f32
    %41 = arith.select %40, %39, %25 : vector<8x128xf32>
    %c0_20 = arith.constant 0 : index
    %c0_21 = arith.constant 0 : index
    %42 = vector.load %arg5[%c0_20, %c0_21] : memref<8x128xf32, #tpu.memory_space<vmem>>, vector<8x128xf32>
    tpu.vector_store %arg5[%c0_20, %c0_21], %41 {strides = array<i32>} : memref<8x128xf32, #tpu.memory_space<vmem>>, vector<8x128xf32>,
    %43 = arith.truncf %41 : vector<8x128xf32> to vector<8x128xbf16>
    %c0_22 = arith.constant 0 : index
    %c0_23 = arith.constant 0 : index
    %44 = vector.load %arg3[%c0_22, %c0_23] : memref<128x128xbf16, #tpu.memory_space<vmem>>, vector<128x128xbf16>
    %cst_24 = arith.constant dense<0.000000e+00> : vector<8x128xf32>
    %45 = tpu.matmul %43, %44, %cst_24 {dimension_numbers = #tpu.dot_dimension_numbers<[1], [1], [0], [0], [0, 0, 1, 0], [], []>} : vector<8x128xbf16>, vector<128x128xbf16>, vector<8x128xf32> -> vector<8x128xf32>
    %c0_25 = arith.constant 0 : index
    %c0_26 = arith.constant 0 : index
    %46 = vector.load %arg4[%c0_25, %c0_26] : memref<8x128xf32, #tpu.memory_space<vmem>>, vector<8x128xf32>
    tpu.vector_store %arg4[%c0_25, %c0_26], %45 {strides = array<i32>} : memref<8x128xf32, #tpu.memory_space<vmem>>, vector<8x128xf32>,
    return
  }
}

</mosaic_0001>

<bundles_post_ra>
// kernel: subnet_mlp_forward.1
= control target key start
LH: loop header
LB: loop body
LE: loop exit
PB: predicated region body
PF: predicated region fallthrough
CT: control target
= control target key end

     0   :  { %v1151_v46 = vmov 0.0   ;;  %vm1152_vm0 = vmmov 0   ;;  %vm392_vm1 = vcmask 130048   ;;  %s1456_s1 = inlined_call_operand.vmem [shape: bf16[128,784], index: 1, kind: input, shape index: {}]   ;;  %s1457_s0 = inlined_call_operand.vmem [shape: bf16[8,784], index: 0, kind: input, shape index: {}]   ;;  %s1458_s2 = inlined_call_operand.vmem [shape: bf16[128,128], index: 2, kind: input, shape index: {}]   ;;  %s1459_s3 = inlined_call_operand.vmem [shape: bf16[128,128], index: 3, kind: input, shape index: {}]   ;;  %s1460_s5 = inlined_call_operand.vmem [shape: f32[8,128], index: 5, kind: output, shape index: {1}]   ;;  %s1461_s4 = inlined_call_operand.vmem [shape: f32[8,128], index: 4, kind: output, shape index: {0}]  }
   0x1   :  { %v1044_v0 = vld [vmem:[%s1456_s1 + $0xc] ss:$28 sps:$4 sm:$0xff]   ;;  %v1047_v2 = vld [vmem:[%s1456_s1 + $0x44] ss:$28 sps:$4 sm:$0xff]   ;;  %v1050_v4 = vld [vmem:[%s1456_s1 + $0x7c] ss:$28 sps:$4 sm:$0xff]  }
   0x2   :  { %v1046_v1 = vld [vmem:[%s1456_s1 + $0x8] ss:$28 sps:$4 sm:$0xff]   ;;  %460 = vmatprep.subr.bf16.mxu0 %v1044_v0  ;;  %v1049_v3 = vld [vmem:[%s1456_s1 + $0x40] ss:$28 sps:$4 sm:$0xff]   ;;  %v1052_v7 = vld [vmem:[%s1456_s1 + $0x78] ss:$28 sps:$4 sm:$0xff]  }
   0x3   :  { %461 = vmatpush1.bf16.xpose.msra.mxu0 %v1046_v1  ;;  %v21_v5 = vld [vmem:[%s1457_s0 + $0x8] sm:$0xff]  ;;  %v1053_v8 = vld [vmem:[%s1456_s1 + $0xb4] ss:$28 sps:$4 sm:$0xff]   ;;  %v1095_v10 = vld [vmem:[%s1456_s1 + $0x4] ss:$28 sps:$4 sm:$0xff]  }
   0x4   :  { %462 = vmatprep.subr.bf16.mxu0 %v1047_v2  ;;  %v859_v6 = vcombine.high %v21_v5, %v21_v5  ;;  %v1055_v9 = vld [vmem:[%s1456_s1 + $0xb0] ss:$28 sps:$4 sm:$0xff]   ;;  %v1097_v11 = vld [vmem:[%s1456_s1] ss:$28 sps:$4 sm:$0xff]   ;;  %420 = vmatprep.subr.bf16.mxu1 %v1095_v10  ;;  %v1058_v14 = vld [vmem:[%s1456_s1 + $0xe8] ss:$28 sps:$4 sm:$0xff]   ;;  %v858_v33 = vcombine.low %v21_v5, %v21_v5 }
   0x5   :  { %v1056_v12 = vld [vmem:[%s1456_s1 + $0xec] ss:$28 sps:$4 sm:$0xff]   ;;  %v1101_v13 = vld [vmem:[%s1456_s1 + $0x3c] ss:$28 sps:$4 sm:$0xff]   ;;  %421 = vmatpush1.bf16.xpose.msra.mxu1 %v1097_v11  ;;  %v1105_v16 = vld [vmem:[%s1456_s1 + $0x74] ss:$28 sps:$4 sm:$0xff]  }
   0x6   :  { %492 = vmatprep.mubr.bf16.mxu0 %v859_v6  ;;  %422 = vmatprep.subr.bf16.mxu1 %v1101_v13  ;;  %v1103_v15 = vld [vmem:[%s1456_s1 + $0x38] ss:$28 sps:$4 sm:$0xff]   ;;  %v1059_v17 = vld [vmem:[%s1456_s1 + $0x124] ss:$28 sps:$4 sm:$0xff]   ;;  %v1107_v18 = vld [vmem:[%s1456_s1 + $0x70] ss:$28 sps:$4 sm:$0xff]  }
   0x7   :  { %v1061_v19 = vld [vmem:[%s1456_s1 + $0x120] ss:$28 sps:$4 sm:$0xff]   ;;  %v1109_v20 = vld [vmem:[%s1456_s1 + $0xac] ss:$28 sps:$4 sm:$0xff]   ;;  %v1064_v23 = vld [vmem:[%s1456_s1 + $0x158] ss:$28 sps:$4 sm:$0xff]  }
   0x8   :  { %v1062_v21 = vld [vmem:[%s1456_s1 + $0x15c] ss:$28 sps:$4 sm:$0xff]   ;;  %v1111_v22 = vld [vmem:[%s1456_s1 + $0xa8] ss:$28 sps:$4 sm:$0xff]   ;;  %v1065_v25 = vld [vmem:[%s1456_s1 + $0x194] ss:$28 sps:$4 sm:$0xff]  }
   0x9   :  { %v1113_v24 = vld [vmem:[%s1456_s1 + $0xe4] ss:$28 sps:$4 sm:$0xff]   ;;  %v1067_v27 = vld [vmem:[%s1456_s1 + $0x190] ss:$28 sps:$4 sm:$0xff]   ;;  %v1117_v28 = vld [vmem:[%s1456_s1 + $0x11c] ss:$28 sps:$4 sm:$0xff]  }
   0xa   :  { %v1115_v26 = vld [vmem:[%s1456_s1 + $0xe0] ss:$28 sps:$4 sm:$0xff]   ;;  %v1073_v29 = vld [vmem:[%s1456_s1 + $0x14] ss:$28 sps:$4 sm:$0xff]   ;;  %v1076_v37 = vld [vmem:[%s1456_s1 + $0x4c] ss:$28 sps:$4 sm:$0xff]  }
   0xb   :  { %463 = vmatpush1.bf16.xpose.msra.mxu0 %v1049_v3  ;;  %v20_v30 = vld [vmem:[%s1457_s0] sm:$0xff]  ;;  %v22_v31 = vld [vmem:[%s1457_s0 + $0x10] sm:$0xff]  ;;  %v1125_v41 = vld [vmem:[%s1456_s1 + $0x18c] ss:$28 sps:$4 sm:$0xff]  }
   0xc   :  { %464 = vmatprep.subr.bf16.mxu0 %v1050_v4  ;;  %v857_v32 = vcombine.high %v20_v30, %v20_v30  ;;  %v1119_v34 = vld [vmem:[%s1456_s1 + $0x118] ss:$28 sps:$4 sm:$0xff]   ;;  %v1071_v35 = vld [vmem:[%s1456_s1 + $0x10] ss:$28 sps:$4 sm:$0xff]   ;;  %v861_v36 = vcombine.high %v22_v31, %v22_v31  ;;  %v1074_v40 = vld [vmem:[%s1456_s1 + $0x48] ss:$28 sps:$4 sm:$0xff]   ;;  %v856_v47 = vcombine.low %v20_v30, %v20_v30  ;;  %v860_v58 = vcombine.low %v22_v31, %v22_v31 }
   0xd   :  { %423 = vmatpush1.bf16.xpose.msra.mxu1 %v1103_v15  ;;  %v1121_v38 = vld [vmem:[%s1456_s1 + $0x154] ss:$28 sps:$4 sm:$0xff]   ;;  %v1079_v42 = vld [vmem:[%s1456_s1 + $0x84] ss:$28 sps:$4 sm:$0xff]   ;;  %v1082_v45 = vld [vmem:[%s1456_s1 + $0xbc] ss:$28 sps:$4 sm:$0xff]  }
   0xe   :  { %424 = vmatprep.subr.bf16.mxu1 %v1105_v16  ;;  %452 = vmatprep.mubr.bf16.mxu1 %v857_v32  ;;  %v1123_v39 = vld [vmem:[%s1456_s1 + $0x150] ss:$28 sps:$4 sm:$0xff]   ;;  %v1127_v43 = vld [vmem:[%s1456_s1 + $0x188] ss:$28 sps:$4 sm:$0xff]   ;;  %v1077_v44 = vld [vmem:[%s1456_s1 + $0x80] ss:$28 sps:$4 sm:$0xff]  }
   0xf   :  { %v1080_v48 = vld [vmem:[%s1456_s1 + $0xb8] ss:$28 sps:$4 sm:$0xff]   ;;  %v1083_v50 = vld [vmem:[%s1456_s1 + $0xf0] ss:$28 sps:$4 sm:$0xff]   ;;  %v1086_v52 = vld [vmem:[%s1456_s1 + $0x128] ss:$28 sps:$4 sm:$0xff]  }
  0x10   :  { %v1085_v49 = vld [vmem:[%s1456_s1 + $0xf4] ss:$28 sps:$4 sm:$0xff]   ;;  %v1088_v51 = vld [vmem:[%s1456_s1 + $0x12c] ss:$28 sps:$4 sm:$0xff]   ;;  %v1091_v53 = vld [vmem:[%s1456_s1 + $0x164] ss:$28 sps:$4 sm:$0xff]  }
  0x11   :  { %v1089_v54 = vld [vmem:[%s1456_s1 + $0x160] ss:$28 sps:$4 sm:$0xff]   ;;  %v1092_v56 = vld [vmem:[%s1456_s1 + $0x198] ss:$28 sps:$4 sm:$0xff]   ;;  %v1104_v60 = vld [vmem:[%s1456_s1 + $0x50] ss:$28 sps:$4 sm:$0xff]  }
  0x12   :  { %v1094_v55 = vld [vmem:[%s1456_s1 + $0x19c] ss:$28 sps:$4 sm:$0xff]   ;;  %v400_v61 = vsel %vm392_vm1, %v1104_v60, 0  ;;  %v1108_v62 = vld [vmem:[%s1456_s1 + $0x88] ss:$28 sps:$4 sm:$0xff]  }
  0x13   :  { %465 = vmatpush1.bf16.xpose.msra.mxu0 %v1052_v7  ;;  %v1100_v57 = vld [vmem:[%s1456_s1 + $0x18] ss:$28 sps:$4 sm:$0xff]   ;;  %v403_v63 = vsel %vm392_vm1, %v1108_v62, 0  ;;  %v1112_v0 = vld [vmem:[%s1456_s1 + $0xc0] ss:$28 sps:$4 sm:$0xff]  }
  0x14   :  { %466 = vmatprep.subr.bf16.mxu0 %v1053_v8  ;;  %v397_v59 = vsel %vm392_vm1, %v1100_v57, 0  ;;  %v406_v1 = vsel %vm392_vm1, %v1112_v0, 0  ;;  %v1116_v2 = vld [vmem:[%s1456_s1 + $0xf8] ss:$28 sps:$4 sm:$0xff]   ;;  %v1120_v4 = vld [vmem:[%s1456_s1 + $0x130] ss:$28 sps:$4 sm:$0xff]  }
  0x15   :  { %425 = vmatpush1.bf16.xpose.msra.mxu1 %v1107_v18  ;;  %v409_v3 = vsel %vm392_vm1, %v1116_v2, 0  ;;  %v412_v5 = vsel %vm392_vm1, %v1120_v4, 0  ;;  %v1124_v6 = vld [vmem:[%s1456_s1 + $0x168] ss:$28 sps:$4 sm:$0xff]   ;;  %v1128_v8 = vld [vmem:[%s1456_s1 + $0x1a0] ss:$28 sps:$4 sm:$0xff]  }
  0x16   :  { %426 = vmatprep.subr.bf16.mxu1 %v1109_v20  ;;  %v415_v7 = vsel %vm392_vm1, %v1124_v6, 0  ;;  %v1070_v10 = vld [vmem:[%s1457_s0 + $0x18] ss:$0 sps:$4 sm:$0xff]   ;;  %v1143_v57 = vld [vmem:[%s1459_s3 + $0x20] sm:$0xff]  }
  0x17   :  { %v1138_v32 = vld [vmem:[%s1458_s2 + $0x38] sm:$0xff]  }
  0x1b   :  { %467 = vmatpush1.bf16.xpose.msra.mxu0 %v1055_v9  ;;  %v418_v9 = vsel %vm392_vm1, %v1128_v8, 0 }
  0x1c   :  { %468 = vmatprep.subr.bf16.mxu0 %v1056_v12 }
  0x1d   :  { %427 = vmatpush1.bf16.xpose.msra.mxu1 %v1111_v22  ;;  %v1131_v22 = vld [vmem:[%s1458_s2] sm:$0xff]  }
  0x1e   :  { %428 = vmatprep.subr.bf16.mxu1 %v1113_v24  ;;  %v1133_v24 = vld [vmem:[%s1458_s2 + $0x10] sm:$0xff]  }
  0x23   :  { %469 = vmatpush1.bf16.xpose.msra.mxu0 %v1058_v14 }
  0x24   :  { %470 = vmatprep.subr.bf16.mxu0 %v1059_v17 }
  0x25   :  { %429 = vmatpush1.bf16.xpose.msra.mxu1 %v1115_v26  ;;  %v1135_v26 = vld [vmem:[%s1458_s2 + $0x20] sm:$0xff]  }
  0x26   :  { %430 = vmatprep.subr.bf16.mxu1 %v1117_v28  ;;  %v1137_v28 = vld [vmem:[%s1458_s2 + $0x30] sm:$0xff]  }
  0x2b   :  { %471 = vmatpush1.bf16.xpose.msra.mxu0 %v1061_v19 }
  0x2c   :  { %472 = vmatprep.subr.bf16.mxu0 %v1062_v21 }
  0x2d   :  { %431 = vmatpush1.bf16.xpose.msra.mxu1 %v1119_v34 }
  0x2e   :  { %432 = vmatprep.subr.bf16.mxu1 %v1121_v38 }
  0x33   :  { %473 = vmatpush1.bf16.xpose.msra.mxu0 %v1064_v23  ;;  %v1132_v23 = vld [vmem:[%s1458_s2 + $0x8] sm:$0xff]  }
  0x34   :  { %474 = vmatprep.subr.bf16.mxu0 %v1065_v25  ;;  %v1134_v25 = vld [vmem:[%s1458_s2 + $0x18] sm:$0xff]  }
  0x35   :  { %433 = vmatpush1.bf16.xpose.msra.mxu1 %v1123_v39 }
  0x36   :  { %434 = vmatprep.subr.bf16.mxu1 %v1125_v41 }
  0x3b   :  { %475 = vmatpush1.bf16.xpose.msra.mxu0 %v1067_v27  ;;  %v1136_v27 = vld [vmem:[%s1458_s2 + $0x28] sm:$0xff]  }
  0x3c   :  { %500 = vmatprep.subr.bf16.mxu0 %v1073_v29 }
  0x3d   :  { %435 = vmatpush1.bf16.xpose.msra.mxu1 %v1127_v43 }
  0x3e   :  { %983 = vmatprep.subr.bf16.mxu1 %v1151_v46 }
  0x42   :  { %493 = vmatmul.mubr.bf16.vlgmr.msra.gmra.mrb[0].mxu0 %v858_v33 }
  0x43   :  { %501 = vmatpush1.bf16.xpose.msra.mxu0 %v1071_v35  ;;  %532 = vmatprep.mubr.bf16.mxu0 %v861_v36 }
  0x44   :  { %502 = vmatprep.subr.bf16.mxu0 %v1076_v37  ;;  %453 = vmatmul.mubr.bf16.vlgmr.msra.gmra.mrb[0].mxu1 %v856_v47 }
  0x45   :  { %999 = vmatprep.mubr.msk.bf16.mxu1 %vm1152_vm0, %v1151_v46  ;;  %984 = vmatpush3.bf16.xpose.msra.mxu1 %v1131_v22 }
  0x46   :  { %985 = vmatprep.subr.bf16.mxu1 %v1151_v46 }
  0x4b   :  { %503 = vmatpush1.bf16.xpose.msra.mxu0 %v1074_v40 }
  0x4c   :  { %504 = vmatprep.subr.bf16.mxu0 %v1079_v42 }
  0x4d   :  { %986 = vmatpush3.bf16.xpose.msra.mxu1 %v1132_v23 }
  0x4e   :  { %987 = vmatprep.subr.bf16.mxu1 %v1151_v46 }
  0x53   :  { %505 = vmatpush1.bf16.xpose.msra.mxu0 %v1077_v44 }
  0x54   :  { %506 = vmatprep.subr.bf16.mxu0 %v1082_v45 }
  0x55   :  { %988 = vmatpush3.bf16.xpose.msra.mxu1 %v1133_v24 }
  0x56   :  { %989 = vmatprep.subr.bf16.mxu1 %v1151_v46 }
  0x5b   :  { %507 = vmatpush1.bf16.xpose.msra.mxu0 %v1080_v48 }
  0x5c   :  { %508 = vmatprep.subr.bf16.mxu0 %v1085_v49 }
  0x5d   :  { %990 = vmatpush3.bf16.xpose.msra.mxu1 %v1134_v25 }
  0x5e   :  { %991 = vmatprep.subr.bf16.mxu1 %v1151_v46 }
  0x63   :  { %509 = vmatpush1.bf16.xpose.msra.mxu0 %v1083_v50 }
  0x64   :  { %510 = vmatprep.subr.bf16.mxu0 %v1088_v51 }
  0x65   :  { %992 = vmatpush3.bf16.xpose.msra.mxu1 %v1135_v26 }
  0x66   :  { %993 = vmatprep.subr.bf16.mxu1 %v1151_v46 }
  0x6b   :  { %511 = vmatpush1.bf16.xpose.msra.mxu0 %v1086_v52 }
  0x6c   :  { %512 = vmatprep.subr.bf16.mxu0 %v1091_v53  ;;  %v1139_v53 = vld [vmem:[%s1459_s3] sm:$0xff]  }
  0x6d   :  { %994 = vmatpush3.bf16.xpose.msra.mxu1 %v1136_v27 }
  0x6e   :  { %995 = vmatprep.subr.bf16.mxu1 %v1151_v46 }
  0x73   :  { %513 = vmatpush1.bf16.xpose.msra.mxu0 %v1089_v54  ;;  %v1140_v54 = vld [vmem:[%s1459_s3 + $0x8] sm:$0xff]  }
  0x74   :  { %514 = vmatprep.subr.bf16.mxu0 %v1094_v55  ;;  %v1141_v55 = vld [vmem:[%s1459_s3 + $0x10] sm:$0xff]  }
  0x75   :  { %996 = vmatpush3.bf16.xpose.msra.mxu1 %v1137_v28 }
  0x76   :  { %997 = vmatprep.subr.bf16.mxu1 %v1151_v46 }
  0x7b   :  { %515 = vmatpush1.bf16.xpose.msra.mxu0 %v1092_v56  ;;  %v1142_v56 = vld [vmem:[%s1459_s3 + $0x18] sm:$0xff]  }
  0x7c   :  { %963 = vmatprep.subr.bf16.mxu0 %v1151_v46 }
  0x7d   :  { %998 = vmatpush3.bf16.xpose.msra.mxu1 %v1138_v32 }
  0x7e   :  { %1003 = vmatprep.subr.bf16.mxu1 %v1151_v46 }
  0x82   :  { %533 = vmatmul.mubr.bf16.vlgmr.msra.gmra.mrb[0].mxu0 %v860_v58  ;;  %v1144_v58 = vld [vmem:[%s1459_s3 + $0x28] sm:$0xff]  }
  0x83   :  { %964 = vmatpush3.bf16.xpose.msra.mxu0 %v397_v59  ;;  %979 = vmatprep.mubr.msk.bf16.mxu0 %vm1152_vm0, %v1151_v46  ;;  %v1145_v59 = vld [vmem:[%s1459_s3 + $0x30] sm:$0xff]  }
  0x84   :  { %965 = vmatprep.subr.bf16.mxu0 %v1151_v46 }
  0x8b   :  { %966 = vmatpush3.bf16.xpose.msra.mxu0 %v400_v61 }
  0x8c   :  { %967 = vmatprep.subr.bf16.mxu0 %v1151_v46 }
  0x93   :  { %968 = vmatpush3.bf16.xpose.msra.mxu0 %v403_v63  ;;  %v1146_v63 = vld [vmem:[%s1459_s3 + $0x38] sm:$0xff]  }
  0x94   :  { %969 = vmatprep.subr.bf16.mxu0 %v1151_v46 }
  0x9b   :  { %970 = vmatpush3.bf16.xpose.msra.mxu0 %v406_v1 }
  0x9c   :  { %971 = vmatprep.subr.bf16.mxu0 %v1151_v46 }
  0xa3   :  { %972 = vmatpush3.bf16.xpose.msra.mxu0 %v409_v3 }
  0xa4   :  { %973 = vmatprep.subr.bf16.mxu0 %v1151_v46 }
  0xab   :  { %974 = vmatpush3.bf16.xpose.msra.mxu0 %v412_v5 }
  0xac   :  { %975 = vmatprep.subr.bf16.mxu0 %v1151_v46 }
  0xb3   :  { %976 = vmatpush3.bf16.xpose.msra.mxu0 %v415_v7 }
  0xb4   :  { %977 = vmatprep.subr.bf16.mxu0 %v1151_v46 }
  0xbb   :  { %978 = vmatpush3.bf16.xpose.msra.mxu0 %v418_v9 }
  0xc2   :  { %980 = vmatmul.mubr.msk.bf16.vlgmr.msra.gmra.mrb[0].mxu0 %vm392_vm1, %v1070_v10 }
 0x117   :  { %v454_v11 = vpop.f32.mrb[0].mxu1 }
 0x118   :  { %v456_v12 = vpop.f32.mrb[1].mxu1 }
 0x119   :  { %v457_v13 = vpop.f32.mrb[2].mxu1 }
 0x11a   :  { %v458_v14 = vpop.f32.mrb[3].mxu1 }
 0x195   :  { %v574_v15 = vpop.f32.mrb[0].mxu0 }
 0x196   :  { %v1023_v16 = vadd.f32 %v574_v15, %v454_v11  ;;  %v981_v17 = vpop.f32.mrb[1].mxu0 }
 0x197   :  { %v577_v18 = vpop.f32.mrb[2].mxu0 }
 0x198   :  { %v580_v19 = vmax.f32 %v1023_v16, 0.0  ;;  %v982_v20 = vpop.f32.mrb[3].mxu0 }
 0x19a   :  { %v581_v21 = vand.u32 2147483647, %v580_v19 }
 0x19c   :  { %582 = vmax.xlane.f32.xlu0 %v581_v21 }
 0x229   :  { %v583_v29 = vpop.xlane.xlu0 %582 }
 0x22a   :  { %v584_v30 = vrot.slane %v583_v29, 4 }
 0x22c   :  { %v585_v31 = vmax.f32 %v583_v29, %v584_v30 }
 0x22e   :  { %v586_v33 = vrot.slane %v585_v31, 2 }
 0x230   :  { %v587_v34 = vmax.f32 %v585_v31, %v586_v33 }
 0x232   :  { %v588_v35 = vrot.slane %v587_v34, 1 }
 0x234   :  { %v589_v36 = vmax.f32 %v587_v34, %v588_v35 }
 0x236   :  { %1032 = vpush %v589_v36 }
 0x267   :  { %s1033_s27 = spop %1032 }
 0x268   :  { %p591_p0 = scmp.gt.f32.partialorder %s1033_s27, 0.0  ;;  %s594_s28 = smul.f32 3.051851e-05, %s1033_s27 }
 0x26a   :  { %s1463_s28 = smov (!%p591_p0, %s594_s28), 1.0 }
 0x26b   :  { %v596_v37 = vstv %s1463_s28  ;;  %s604_s29 = scalar_select %p591_p0, 1, 0 }
 0x26c   :  { %1147 = vrcp.f32 %v596_v37 }
 0x26d   :  { %v605_v41 = vstv %s604_s29 }
 0x26e   :  { %vm606_vm2 = vcmp.eq.s32.totalorder %v605_v41, 1 }
 0x276   :  { %v1148_v38 = vpop.eup %1147 }
 0x277   :  { %1034 = vpush %v1148_v38 }
 0x2a8   :  { %s1035_s30 = spop %1034 }
 0x2a9   :  { %v599_v39 = vstv %s1035_s30 }
 0x2aa   :  { %v600_v40 = vmul.f32 %v599_v39, %v580_v19 }
 0x2ac   :  { %v1036_v42 = vround.rtne.f32 %v600_v40 }
 0x2ae   :  { %v603_v43 = vmul.f32 %v1036_v42, %v596_v37 }
 0x2b0   :  { %v607_v44 = vsel %vm606_vm2, %v603_v43, %v580_v19 }
 0x2b1   :  { %v608_v45 = vpack.c.bf16 %v607_v44, %v607_v44 }
 0x2b3   :  { %1000 = vmatmul.mubr.bf16.vlgmr.msra.gmra.mrb[4].mxu1 %v608_v45 }
 0x2b4   :  { %1019 = vmatprep.mubr.msk.bf16.mxu1 %vm1152_vm0, %v1151_v46  ;;  %1004 = vmatpush3.bf16.xpose.msra.mxu1 %v1139_v53 }
 0x2b5   :  { %1005 = vmatprep.subr.bf16.mxu1 %v1151_v46 }
 0x2bc   :  { %1006 = vmatpush3.bf16.xpose.msra.mxu1 %v1140_v54 }
 0x2bd   :  { %1007 = vmatprep.subr.bf16.mxu1 %v1151_v46 }
 0x2c4   :  { %1008 = vmatpush3.bf16.xpose.msra.mxu1 %v1141_v55 }
 0x2c5   :  { %1009 = vmatprep.subr.bf16.mxu1 %v1151_v46 }
 0x2cc   :  { %1010 = vmatpush3.bf16.xpose.msra.mxu1 %v1142_v56 }
 0x2cd   :  { %1011 = vmatprep.subr.bf16.mxu1 %v1151_v46 }
 0x2d4   :  { %1012 = vmatpush3.bf16.xpose.msra.mxu1 %v1143_v57 }
 0x2d5   :  { %1013 = vmatprep.subr.bf16.mxu1 %v1151_v46 }
 0x2dc   :  { %1014 = vmatpush3.bf16.xpose.msra.mxu1 %v1144_v58 }
 0x2dd   :  { %1015 = vmatprep.subr.bf16.mxu1 %v1151_v46 }
 0x2e4   :  { %1016 = vmatpush3.bf16.xpose.msra.mxu1 %v1145_v59 }
 0x2e5   :  { %1017 = vmatprep.subr.bf16.mxu1 %v1151_v46 }
 0x2ec   :  { %1018 = vmatpush3.bf16.xpose.msra.mxu1 %v1146_v63 }
 0x386   :  { %v707_v47 = vpop.f32.mrb[4].mxu1 }
 0x387   :  { %v713_v48 = vmax.f32 %v707_v47, 0.0  ;;  %v1001_v49 = vpop.f32.mrb[5].mxu1 }
 0x388   :  { %v710_v50 = vpop.f32.mrb[6].mxu1 }
 0x389   :  { %v1002_v51 = vpop.f32.mrb[7].mxu1  ;;  %v714_v52 = vand.u32 2147483647, %v713_v48 }
 0x38b   :  { %715 = vmax.xlane.f32.xlu0 %v714_v52 }
 0x418   :  { %v716_v60 = vpop.xlane.xlu0 %715 }
 0x419   :  { %v717_v61 = vrot.slane %v716_v60, 4 }
 0x41b   :  { %v718_v62 = vmax.f32 %v716_v60, %v717_v61 }
 0x41d   :  { %v719_v0 = vrot.slane %v718_v62, 2 }
 0x41f   :  { %v720_v1 = vmax.f32 %v718_v62, %v719_v0 }
 0x421   :  { %v721_v2 = vrot.slane %v720_v1, 1 }
 0x423   :  { %v722_v3 = vmax.f32 %v720_v1, %v721_v2 }
 0x425   :  { %1037 = vpush %v722_v3 }
 0x456   :  { %s1038_s19 = spop %1037 }
 0x457   :  { %p724_p1 = scmp.gt.f32.partialorder %s1038_s19, 0.0  ;;  %s727_s20 = smul.f32 3.051851e-05, %s1038_s19 }
 0x459   :  { %s1465_s20 = smov (!%p724_p1, %s727_s20), 1.0 }
 0x45a   :  { %v729_v4 = vstv %s1465_s20  ;;  %s737_s21 = scalar_select %p724_p1, 1, 0 }
 0x45b   :  { %1149 = vrcp.f32 %v729_v4 }
 0x45c   :  { %v738_v7 = vstv %s737_s21 }
 0x45d   :  { %vm739_vm3 = vcmp.eq.s32.totalorder %v738_v7, 1 }
 0x465   :  { %v1150_v46 = vpop.eup %1149 }
 0x466   :  { %1039 = vpush %v1150_v46 }
 0x497   :  { %s1040_s22 = spop %1039 }
 0x498   :  { %v732_v5 = vstv %s1040_s22 }
 0x499   :  { %v733_v6 = vmul.f32 %v732_v5, %v713_v48 }
 0x49b   :  { %v1041_v8 = vround.rtne.f32 %v733_v6 }
 0x49d   :  { %v736_v9 = vmul.f32 %v1041_v8, %v729_v4 }
 0x49f   :  { %v740_v10 = vsel %vm739_vm3, %v736_v9, %v713_v48 }
 0x4a0   :  { %741 = vst [vmem:[%s1460_s5] sm:$0xff] %v740_v10  ;;  %v742_v11 = vpack.c.bf16 %v740_v10, %v740_v10 }
 0x4a2   :  { %1020 = vmatmul.mubr.bf16.vlgmr.msra.gmra.mrb[8].mxu1 %v742_v11 }
 0x575   :  { %v841_v12 = vpop.f32.mrb[8].mxu1 }
 0x576   :  { %847 = vst [vmem:[%s1461_s4] sm:$0xff] %v841_v12  ;;  %v1021_v13 = vpop.f32.mrb[9].mxu1 }
 0x577   :  { %v844_v14 = vpop.f32.mrb[10].mxu1 }
 0x578   :  { %v1022_v15 = vpop.f32.mrb[11].mxu1 }

</bundles_post_ra>
